<compile_context>
chip_gen: v7x
topology: tpu7x:2x2x1
jax: 0.10.0
libtpu: 0.0.40
codegen_flags: <defaults>
</compile_context>

<pallas_src>
import functools

import jax
import jax.numpy as jnp
from jax.experimental import pallas as pl
from jax.experimental.pallas import tpu as pltpu

LANES = 128
SUBLANES = 8


def _round_up(x, m):
    return ((x + m - 1) // m) * m


def _tpu_generation_params():
    """Return (num_tensorcores, per-input tile bytes) tuned per TPU generation."""
    try:
        kind = jax.devices()[0].device_kind.lower()
    except Exception:  # pragma: no cover - defensive; fall back to safe values
        kind = ""
    if "v7" in kind:
        # 2 TensorCores / chip, 3.2 TB/s HBM per TC: larger tiles re-amortize the
        # ~0.35 us per-grid-step overhead; 2 inputs x 2 buffers x 2 MiB = 8 MiB
        # stays well under the 32 MiB scoped-VMEM default.
        return 2, 2 * 1024 * 1024
    # v5e / v6e (and anything unknown): 1 TensorCore; 1 MiB tiles already sit
    # near the HBM roofline and keep VMEM usage far below v5e's 16 MiB default.
    return 1, 1 * 1024 * 1024


def _xtanh_kernel(y_ref, yp_ref, out_ref, *, rows, block_rows, blocks_per_core):
    p = pl.program_id(0)      # core slice (parallel axis)
    i = pl.program_id(1)      # block within the core slice (arbitrary / sequential)

    # The (8, 128) output block is resident across the arbitrary axis: it is the
    # per-core vector accumulator. Initialize it on the first block of each slice.
    @pl.when(i == 0)
    def _init():
        out_ref[...] = jnp.zeros_like(out_ref)

    # Global (unclamped) block index and number of valid rows in this block.
    g = p * blocks_per_core + i
    remaining = rows - g * block_rows   # may be <= 0 for fully out-of-range steps

    e = y_ref[...].astype(jnp.float32) - yp_ref[...].astype(jnp.float32)
    prod = e * jnp.tanh(e)              # tanh -> EUP slot; essentially free when HBM-bound

    groups = block_rows // SUBLANES

    # Fast path (the common case): every row in this block is valid, no mask work.
    @pl.when(remaining >= block_rows)
    def _full_block():
        out_ref[...] += prod.reshape(groups, SUBLANES, LANES).sum(axis=0)

    # Slow path: partial last block or a clamped out-of-range step.  jnp.where
    # (select) discards any undefined/NaN data read from the padded region.
    @pl.when(remaining < block_rows)
    def _partial_block():
        row_id = jax.lax.broadcasted_iota(jnp.int32, (block_rows, LANES), 0)
        masked = jnp.where(row_id < remaining, prod, 0.0)
        out_ref[...] += masked.reshape(groups, SUBLANES, LANES).sum(axis=0)


def xtanh_loss(y_t, y_prime_t):
    """Scalar XTanh loss: mean((y - y') * tanh(y - y')), via a Pallas TPU kernel."""
    assert y_t.shape == y_prime_t.shape, "shapes must match (no broadcasting here)"
    total = y_t.size

    flat_y = jnp.ravel(y_t)          # free bitcast for contiguous inputs (no copy)
    flat_yp = jnp.ravel(y_prime_t)

    main = (total // LANES) * LANES  # lane-aligned prefix handled by the kernel
    tail = total - main

    tail_sum = jnp.float32(0.0)
    if tail:
        # Tiny (<128 element) tail handled with plain JAX; negligible compute.
        te = flat_y[main:].astype(jnp.float32) - flat_yp[main:].astype(jnp.float32)
        tail_sum = jnp.sum(te * jnp.tanh(te))
        if main == 0:
            # No full lane rows at all -> pure-JAX path (kernel would be all overhead).
            return tail_sum / jnp.float32(total)
        # TODO(synk): for large lane-misaligned inputs these prefix slices force a
        # full extra HBM copy of both inputs before the custom call; pass tensors
        # with size % 128 == 0 to avoid it (lane-aligned inputs take the zero-copy path).
        flat_y = flat_y[:main]
        flat_yp = flat_yp[:main]

    rows = main // LANES
    y2d = flat_y.reshape(rows, LANES)      # lane-dense 2-D view; no padding, no cast
    yp2d = flat_yp.reshape(rows, LANES)

    ncores, tile_bytes = _tpu_generation_params()
    itemsize = jnp.dtype(y_t.dtype).itemsize
    # Dtype-aware tile: keep bytes/step constant (bf16 gets 2x the rows of f32).
    block_rows = max(SUBLANES, (tile_bytes // (LANES * itemsize)) // SUBLANES * SUBLANES)
    block_rows = int(min(block_rows, _round_up(rows, SUBLANES)))

    num_blocks = pl.cdiv(rows, block_rows)
    ncores = max(1, min(ncores, num_blocks))      # never more cores than blocks
    blocks_per_core = pl.cdiv(num_blocks, ncores)

    kernel = functools.partial(
        _xtanh_kernel, rows=rows, block_rows=block_rows,
        blocks_per_core=blocks_per_core)

    def in_map(p, i):
        g = p * blocks_per_core + i
        # Clamp (rare) out-of-range grid steps to a valid block; their contribution
        # is zeroed by the in-kernel masked path.
        return (jnp.minimum(g, num_blocks - 1), 0)

    partial_sums = pl.pallas_call(
        kernel,
        out_shape=jax.ShapeDtypeStruct((ncores * SUBLANES, LANES), jnp.float32),
        grid_spec=pltpu.PrefetchScalarGridSpec(
            num_scalar_prefetch=0,
            grid=(ncores, blocks_per_core),
            in_specs=[
                pl.BlockSpec((block_rows, LANES), in_map),
                pl.BlockSpec((block_rows, LANES), in_map),
            ],
            out_specs=pl.BlockSpec((SUBLANES, LANES), lambda p, i: (p, 0)),
        ),
        compiler_params=pltpu.CompilerParams(
            dimension_semantics=("parallel", "arbitrary"),
        ),
    )(y2d, yp2d)

    # Final cross-lane reduce over the tiny (ncores*8, 128) partial-sum slab and
    # the mean divide happen once, outside the hot loop.
    return (jnp.sum(partial_sums) + tail_sum) / jnp.float32(total)


def xtanh_loss_ref(y_t, y_prime_t):
    e = y_t.astype(jnp.float32) - y_prime_t.astype(jnp.float32)
    return jnp.mean(e * jnp.tanh(e))


if __name__ == "__main__":
    key = jax.random.PRNGKey(0)
    k1, k2 = jax.random.split(key)
    # Small NCHW-shaped tensors (the loss is layout-agnostic; mean over all elems).
    shape = (2, 4, 16, 16)
    y_t = jax.random.normal(k1, shape, dtype=jnp.float32)
    y_prime_t = jax.random.normal(k2, shape, dtype=jnp.float32)

    loss = jax.block_until_ready(xtanh_loss(y_t, y_prime_t))
    ref = jax.block_until_ready(xtanh_loss_ref(y_t, y_prime_t))

    assert jnp.allclose(loss, ref, rtol=1e-5, atol=1e-6), (loss, ref)
    print("KERNEL_OK")
</pallas_src>

<mosaic_0001>
module attributes {stable_mosaic.version = 11 : i64} {
  func.func @_xtanh_kernel(%arg0: i32, %arg1: i32, %arg2: memref<16x128xf32, #tpu.memory_space<vmem>>, %arg3: memref<16x128xf32, #tpu.memory_space<vmem>>, %arg4: memref<8x128xf32, #tpu.memory_space<vmem>>) attributes {dimension_semantics = [#tpu.dimension_semantics<parallel>, #tpu.dimension_semantics<arbitrary>], iteration_bounds = array<i64: 1, 1>, scalar_prefetch = 0 : i64, scratch_operands = 0 : i64, tpu.core_type = #tpu.core_type<tc>, window_params = [{transform_indices = @transform_0, window_bounds = array<i64: 16, 128>}, {transform_indices = @transform_1, window_bounds = array<i64: 16, 128>}, {transform_indices = @transform_2, window_bounds = array<i64: 8, 128>}]} {
    %c0_i32 = arith.constant 0 : i32
    %0 = arith.cmpi eq, %arg1, %c0_i32 : i32
    %1 = arith.extui %0 : i1 to i32
    %c0_i32_0 = arith.constant 0 : i32
    %2 = arith.cmpi ne, %1, %c0_i32_0 : i32
    scf.if %2 {
      %cst = arith.constant 0.000000e+00 : f32
      %18 = vector.broadcast %cst : f32 to vector<8x128xf32>
      %c0_9 = arith.constant 0 : index
      %c0_10 = arith.constant 0 : index
      %19 = vector.load %arg4[%c0_9, %c0_10] : memref<8x128xf32, #tpu.memory_space<vmem>>, vector<8x128xf32>
      tpu.vector_store %arg4[%c0_9, %c0_10], %18 {strides = array<i32>} : memref<8x128xf32, #tpu.memory_space<vmem>>, vector<8x128xf32>,
    } else {
    }
    %c1_i32 = arith.constant 1 : i32
    %3 = arith.muli %arg0, %c1_i32 : i32
    %4 = arith.addi %3, %arg1 : i32
    %c16_i32 = arith.constant 16 : i32
    %5 = arith.muli %4, %c16_i32 : i32
    %c16_i32_1 = arith.constant 16 : i32
    %6 = arith.subi %c16_i32_1, %5 : i32
    %c0 = arith.constant 0 : index
    %c0_2 = arith.constant 0 : index
    %7 = vector.load %arg2[%c0, %c0_2] : memref<16x128xf32, #tpu.memory_space<vmem>>, vector<16x128xf32>
    %c0_3 = arith.constant 0 : index
    %c0_4 = arith.constant 0 : index
    %8 = vector.load %arg3[%c0_3, %c0_4] : memref<16x128xf32, #tpu.memory_space<vmem>>, vector<16x128xf32>
    %9 = arith.subf %7, %8 : vector<16x128xf32>
    %10 = math.tanh %9 : vector<16x128xf32>
    %11 = arith.mulf %9, %10 : vector<16x128xf32>
    %c16_i32_5 = arith.constant 16 : i32
    %12 = arith.cmpi sge, %6, %c16_i32_5 : i32
    %13 = arith.extui %12 : i1 to i32
    %c0_i32_6 = arith.constant 0 : i32
    %14 = arith.cmpi ne, %13, %c0_i32_6 : i32
    scf.if %14 {
      %c0_9 = arith.constant 0 : index
      %c0_10 = arith.constant 0 : index
      %18 = vector.load %arg4[%c0_9, %c0_10] : memref<8x128xf32, #tpu.memory_space<vmem>>, vector<8x128xf32>
      %19 = vector.shape_cast %11 : vector<16x128xf32> to vector<2x8x128xf32>
      %cst = arith.constant dense<0.000000e+00> : vector<8x128xf32>
      %20 = vector.multi_reduction <add>, %19, %cst [0] : vector<2x8x128xf32> to vector<8x128xf32>
      %21 = arith.addf %18, %20 : vector<8x128xf32>
      %c0_11 = arith.constant 0 : index
      %c0_12 = arith.constant 0 : index
      %22 = vector.load %arg4[%c0_11, %c0_12] : memref<8x128xf32, #tpu.memory_space<vmem>>, vector<8x128xf32>
      tpu.vector_store %arg4[%c0_11, %c0_12], %21 {strides = array<i32>} : memref<8x128xf32, #tpu.memory_space<vmem>>, vector<8x128xf32>,
    } else {
    }
    %c16_i32_7 = arith.constant 16 : i32
    %15 = arith.cmpi slt, %6, %c16_i32_7 : i32
    %16 = arith.extui %15 : i1 to i32
    %c0_i32_8 = arith.constant 0 : i32
    %17 = arith.cmpi ne, %16, %c0_i32_8 : i32
    scf.if %17 {
      %18 = tpu.iota {dimensions = array<i32: 0>} : vector<16x128xi32>
      %19 = vector.broadcast %6 : i32 to vector<16x128xi32>
      %20 = arith.cmpi slt, %18, %19 : vector<16x128xi32>
      %cst = arith.constant 0.000000e+00 : f32
      %21 = vector.broadcast %cst : f32 to vector<16x128xf32>
      %22 = arith.select %20, %11, %21 : vector<16x128xi1>, vector<16x128xf32>
      %c0_9 = arith.constant 0 : index
      %c0_10 = arith.constant 0 : index
      %23 = vector.load %arg4[%c0_9, %c0_10] : memref<8x128xf32, #tpu.memory_space<vmem>>, vector<8x128xf32>
      %24 = vector.shape_cast %22 : vector<16x128xf32> to vector<2x8x128xf32>
      %cst_11 = arith.constant dense<0.000000e+00> : vector<8x128xf32>
      %25 = vector.multi_reduction <add>, %24, %cst_11 [0] : vector<2x8x128xf32> to vector<8x128xf32>
      %26 = arith.addf %23, %25 : vector<8x128xf32>
      %c0_12 = arith.constant 0 : index
      %c0_13 = arith.constant 0 : index
      %27 = vector.load %arg4[%c0_12, %c0_13] : memref<8x128xf32, #tpu.memory_space<vmem>>, vector<8x128xf32>
      tpu.vector_store %arg4[%c0_12, %c0_13], %26 {strides = array<i32>} : memref<8x128xf32, #tpu.memory_space<vmem>>, vector<8x128xf32>,
    } else {
    }
    return
  }
  func.func @transform_0(%arg0: i32, %arg1: i32) -> (i32, i32) {
    %c1_i32 = arith.constant 1 : i32
    %0 = arith.muli %arg0, %c1_i32 : i32
    %1 = arith.addi %0, %arg1 : i32
    %c0_i32 = arith.constant 0 : i32
    %2 = arith.minsi %1, %c0_i32 : i32
    %c0_i32_0 = arith.constant 0 : i32
    %c0_i32_1 = arith.constant 0 : i32
    return %2, %c0_i32_0 : i32, i32
  }
  func.func @transform_1(%arg0: i32, %arg1: i32) -> (i32, i32) {
    %c1_i32 = arith.constant 1 : i32
    %0 = arith.muli %arg0, %c1_i32 : i32
    %1 = arith.addi %0, %arg1 : i32
    %c0_i32 = arith.constant 0 : i32
    %2 = arith.minsi %1, %c0_i32 : i32
    %c0_i32_0 = arith.constant 0 : i32
    %c0_i32_1 = arith.constant 0 : i32
    return %2, %c0_i32_0 : i32, i32
  }
  func.func @transform_2(%arg0: i32, %arg1: i32) -> (i32, i32) {
    %c0_i32 = arith.constant 0 : i32
    %c0_i32_0 = arith.constant 0 : i32
    return %arg0, %c0_i32 : i32, i32
  }
}

</mosaic_0001>

<bundles_post_ra>
// kernel: tpu_custom_call.1
= control target key start
LH: loop header
LB: loop body
LE: loop exit
PB: predicated region body
PF: predicated region fallthrough
CT: control target
= control target key end

     0   :  { %7 = vsyncpa [#allocation3], 0  ;;  %s260_s0 = inlined_call_operand.hbm [shape: f32[16,128], index: 0, kind: input, shape index: {}]   ;;  %s261_s1 = inlined_call_operand.hbm [shape: f32[16,128], index: 1, kind: input, shape index: {}]   ;;  %s262_s2 = inlined_call_operand.hbm [shape: f32[8,128], index: 2, kind: output, shape index: {}]  }
   0x1   :  { %8 = vsyncpa [#allocation6], 0 }
   0x2   :  { %9 = vsyncpa [#allocation4], 0  ;;  %s204_s9 = smov [#allocation2]   ;;  %s132_s13 = scalar_lea.hbm %s260_s0, 256 }
   0x3   :  { %s21_s10 = sshll.u32 %s204_s9, 4  ;;  %p133_p0 = scmp.ne.s32.totalorder %s260_s0, %s132_s13  ;;  %s22_s10 = int_to_ptr.vmem [resolvable:$true] %s21_s10 }
   0x4   :  { %p136_p1 = scmp.lt.u32.totalorder %s132_s13, %s260_s0 }
   0x6   :  { %p138_p2 = pnand %p136_p1, %p133_p0 }
   0x8   :  { %141 = shalt.err (!%p138_p2)
}
   0x9   :  { %s142_s18 = scalar_lea.vmem %s22_s10, 256  ;;  %p147_p4 = scmp.lt.s32.totalorder %s22_s10, %s22_s10 }
   0xa   :  { %p143_p3 = scmp.ne.s32.totalorder %s22_s10, %s142_s18  ;;  %p148_p5 = scmp.lt.s32.totalorder %s142_s18, %s142_s18 }
   0xc   :  { %p149_p6 = por %p148_p5, %p147_p4 }
   0xe   :  { %p150_p7 = pnand %p149_p6, %p143_p3 }
  0x10   :  { %153 = shalt.err (!%p150_p7)
}
  0x11   :  { %s205_s19 = smov 128   ;;  %s206_s20 = smov 8  }
  0x12   :  { %27 = dma.hbm_to_vmem [thread:$0]  %s260_s0, 256, %s22_s10, [#allocation3], %s205_s19, %s205_s19, %s206_s20  }
  0x13   :  { %s207_s23 = smov [#allocation5]   ;;  %s154_s27 = scalar_lea.hbm %s261_s1, 256 }
  0x14   :  { %s39_s24 = sshll.u32 %s207_s23, 4  ;;  %p155_p8 = scmp.ne.s32.totalorder %s261_s1, %s154_s27  ;;  %s40_s24 = int_to_ptr.vmem [resolvable:$true] %s39_s24 }
  0x15   :  { %p158_p9 = scmp.lt.u32.totalorder %s154_s27, %s261_s1 }
  0x17   :  { %p160_p10 = pnand %p158_p9, %p155_p8 }
  0x19   :  { %163 = shalt.err (!%p160_p10)
}
  0x1a   :  { %s164_s4 = scalar_lea.vmem %s40_s24, 256  ;;  %p169_p12 = scmp.lt.s32.totalorder %s40_s24, %s40_s24 }
  0x1b   :  { %p165_p11 = scmp.ne.s32.totalorder %s40_s24, %s164_s4  ;;  %p170_p13 = scmp.lt.s32.totalorder %s164_s4, %s164_s4 }
  0x1d   :  { %p171_p0 = por %p170_p13, %p169_p12 }
  0x1f   :  { %p172_p1 = pnand %p171_p0, %p165_p11 }
  0x21   :  { %175 = shalt.err (!%p172_p1)
}
  0x22   :  { %45 = dma.hbm_to_vmem [thread:$0]  %s261_s1, 256, %s40_s24, [#allocation6], %s205_s19, %s205_s19, %s206_s20  }
  0x23   :  { %198 = dma.done.wait [#allocation3], 256  }
  0x24   :  { %199 = vsyncadd [#allocation3], 4294967040 }
  0x25   :  { %200 = dma.done.wait [#allocation6], 256  }
  0x26   :  { %201 = vsyncadd [#allocation6], 4294967040  ;;  %v68_v0 = vld [vmem:[#allocation2] sm:$0xff]  ;;  %v69_v1 = vld [vmem:[#allocation2 + $0x8] sm:$0xff]  ;;  %s208_s6 = smov [#allocation7]  }
  0x27   :  { %v70_v2 = vld [vmem:[#allocation5] sm:$0xff]  ;;  %v71_v3 = vld [vmem:[#allocation5 + $0x8] sm:$0xff]  ;;  %s108_s7 = sshll.u32 %s208_s6, 4  ;;  %s109_s7 = int_to_ptr.vmem [resolvable:$true] %s108_s7 }
  0x28   :  { %v72_v4 = vsub.f32 %v68_v0, %v70_v2  ;;  %v73_v5 = vsub.f32 %v69_v1, %v71_v3  ;;  %s176_s1 = scalar_lea.vmem %s109_s7, 128  ;;  %p181_p3 = scmp.lt.s32.totalorder %s109_s7, %s109_s7 }
  0x29   :  { %p177_p2 = scmp.ne.s32.totalorder %s109_s7, %s176_s1  ;;  %p182_p4 = scmp.lt.s32.totalorder %s176_s1, %s176_s1 }
  0x2a   :  { %128 = vtanh.f32 %v72_v4 }
  0x2b   :  { %130 = vtanh.f32 %v73_v5  ;;  %p183_p5 = por %p182_p4, %p181_p3 }
  0x2d   :  { %p184_p6 = pnand %p183_p5, %p177_p2 }
  0x34   :  { %v129_v6 = vpop.eup %128 }
  0x35   :  { %v131_v7 = vpop.eup %130  ;;  %v76_v8 = vmul.f32 %v129_v6, %v72_v4 }
  0x36   :  { %v77_v9 = vmul.f32 %v131_v7, %v73_v5 }
  0x38   :  { %v83_v10 = vadd.f32 %v77_v9, %v76_v8 }
  0x3a   :  { %85 = vst [vmem:[#allocation7] sm:$0xff] %v83_v10 }
  0x3b   :  { %187 = shalt.err (!%p184_p6)
}
  0x3c   :  { %s188_s10 = scalar_lea.hbm %s262_s2, 128 }
  0x3d   :  { %p189_p7 = scmp.ne.s32.totalorder %s262_s2, %s188_s10  ;;  %p192_p8 = scmp.lt.u32.totalorder %s188_s10, %s262_s2 }
  0x3f   :  { %p194_p9 = pnand %p192_p8, %p189_p7 }
  0x41   :  { %197 = shalt.err (!%p194_p9)
}
  0x42   :  { %111 = dma.vmem_to_hbm [thread:$0]  %s109_s7, 128, %s262_s2, [#allocation4]  }
  0x43   :  { %202 = dma.done.wait [#allocation4], 128  }
  0x44   :  { %203 = vsyncadd [#allocation4], 4294967168 }
  0x45   :  { %115 = vsyncpa [#allocation3], 1 }
  0x46   :  { %116 = vsyncpa [#allocation6], 1 }
  0x47   :  { %117 = vsyncpa [#allocation4], 1 }

</bundles_post_ra>
